<compile_context>
chip_gen: v7x
topology: tpu7x:2x2x1
jax: 0.10.0
libtpu: 0.0.40
codegen_flags: <defaults>
</compile_context>

<pallas_src>
import jax
import jax.numpy as jnp
from jax.experimental import pallas as pl
from jax.experimental.pallas import tpu as pltpu


def _mlp_kernel(x_ref, w1_ref, b1_ref, w2_ref, b2_ref, w3_ref, b3_ref, o_ref):
    # x: (TM, H) -- batch on sublanes, features on lanes (natural layout).
    x = x_ref[...]

    # Layer 1, computed transposed: h1t[o, n] = sum_h W1[o, h] * x[n, h] -> (H, TM)
    h1t = jax.lax.dot_general(
        w1_ref[...], x, (((1,), (1,)), ((), ())),
        preferred_element_type=jnp.float32,
    ) + b1_ref[...]                                    # (H, 1) broadcasts over lanes
    o1t = jnp.tanh(h1t)                                # (H, TM), f32 (EUP)

    # Layer 2: h2t = W2 @ o1t -> (H2, TM)
    h2t = jnp.dot(
        w2_ref[...], o1t.astype(w2_ref.dtype),
        preferred_element_type=jnp.float32,
    ) + b2_ref[...]
    r2t = jnp.maximum(h2t, 0.0)                        # (H2, TM), f32 (VPU)

    # Layer 3: degenerate (K=H2, N=1) matmul -> VPU multiply + sublane reduce (XLU).
    z = jnp.sum(r2t * w3_ref[...], axis=0, keepdims=True) + b3_ref[0, 0]   # (1, TM)

    # Sigmoid: EUP exp + exact reciprocal; lane-dense (1, TM) store.
    o_ref[...] = pl.reciprocal(1.0 + jnp.exp(-z), approx=False).astype(o_ref.dtype)


def _pick_tile_m(n_rows):
    # Prefer the biggest lane-aligned tile (multiple of 128) that still gives >= 2
    # grid steps, so the x-tile DMA pipelines and v7x's second TC gets a share;
    # otherwise fall back to a single full block (handles small / unaligned N).
    for tm in (8192, 4096, 2048, 1024, 512, 256, 128):
        if tm < n_rows and n_rows % tm == 0:
            return tm
    return n_rows


def formula_judgement(x, w1, b1, w2, b2, w3, b3, *, tile_m=None):
    """Forward pass of Formula_Judgement.

    x : (N, H) activations (f32 or bf16; MXU weights follow x's dtype).
    w1: (H, H)   PyTorch-layout (out, in) weight of f1;  b1: (H, 1)
    w2: (H2, H)  PyTorch-layout weight of f2;            b2: (H2, 1)
    w3: (H2, 1)  output weight as a column;               b3: (1, 1)
    Returns (N, 1) float32 sigmoid scores.
    """
    N, H = x.shape
    H2 = w2.shape[0]
    tm = _pick_tile_m(N) if tile_m is None else tile_m
    assert N % tm == 0, (N, tm)

    # MXU operands follow x's dtype; biases / w3 / activation math stay f32.
    w1 = w1.astype(x.dtype)
    w2 = w2.astype(x.dtype)

    const = lambda i: (0, 0)
    out = pl.pallas_call(
        _mlp_kernel,
        out_shape=jax.ShapeDtypeStruct((1, N), jnp.float32),
        grid_spec=pltpu.PrefetchScalarGridSpec(
            num_scalar_prefetch=0,
            grid=(N // tm,),
            in_specs=[
                pl.BlockSpec((tm, H), lambda i: (i, 0)),             # x tile (pipelined)
                pl.BlockSpec((H, H), const),                         # W1 (VMEM-resident)
                pl.BlockSpec((H, 1), const),                         # b1
                pl.BlockSpec((H2, H), const),                        # W2
                pl.BlockSpec((H2, 1), const),                        # b2
                pl.BlockSpec((H2, 1), const),                        # w3 column
                pl.BlockSpec(memory_space=pltpu.MemorySpace.SMEM),   # b3 scalar
            ],
            out_specs=pl.BlockSpec((1, tm), lambda i: (0, i)),       # lane-dense output
        ),
        compiler_params=pltpu.CompilerParams(
            dimension_semantics=("parallel",)),
    )(x, w1, b1.astype(jnp.float32), w2, b2.astype(jnp.float32),
      w3.astype(jnp.float32), b3.astype(jnp.float32))

    # (1, N) -> (N, 1) is a free row-major reshape.
    return out.reshape(N, 1)


def init_params(key, hidden_size):
    """PyTorch-style uniform init; returned in the kernel's layout (weights stay (out, in))."""
    h, h2 = hidden_size, hidden_size // 2
    ks = jax.random.split(key, 6)

    def linear(kw, kb, fan_in, fan_out):
        bound = 1.0 / jnp.sqrt(fan_in)
        w = jax.random.uniform(kw, (fan_out, fan_in), jnp.float32, -bound, bound)
        b = jax.random.uniform(kb, (fan_out,), jnp.float32, -bound, bound)
        return w, b

    w1, b1 = linear(ks[0], ks[1], h, h)
    w2, b2 = linear(ks[2], ks[3], h, h2)
    w3, b3 = linear(ks[4], ks[5], h2, 1)
    return (w1, b1.reshape(h, 1),
            w2, b2.reshape(h2, 1),
            w3.reshape(h2, 1), b3.reshape(1, 1))


def reference(x, w1, b1, w2, b2, w3, b3):
    o1 = jnp.tanh(x @ w1.T + b1[:, 0])
    r2 = jax.nn.relu(o1 @ w2.T + b2[:, 0])
    return jax.nn.sigmoid(r2 @ w3 + b3[0, 0])


if __name__ == "__main__":
    hidden_size = 32

    key = jax.random.PRNGKey(0)
    kx, kp, kx2 = jax.random.split(key, 3)
    params = init_params(kp, hidden_size)

    # Small shape (single grid step, full-block path).
    x = jax.random.normal(kx, (8, hidden_size), jnp.float32)
    out = jax.block_until_ready(formula_judgement(x, *params))
    ref = reference(x, *params)
    assert out.shape == (8, 1)
    assert jnp.allclose(out, ref, atol=1e-5, rtol=1e-5), (out, ref)

    # Larger shape to exercise the multi-step, lane-dense tiled path (grid = 2).
    x2 = jax.random.normal(kx2, (256, hidden_size), jnp.float32)
    out2 = jax.block_until_ready(formula_judgement(x2, *params))
    ref2 = reference(x2, *params)
    assert out2.shape == (256, 1)
    assert jnp.allclose(out2, ref2, atol=1e-5, rtol=1e-5)

    print("KERNEL_OK")
</pallas_src>

<mosaic_0001>
module attributes {stable_mosaic.version = 11 : i64} {
  func.func @_mlp_kernel(%arg0: i32, %arg1: memref<8x32xf32, #tpu.memory_space<vmem>>, %arg2: memref<32x32xf32, #tpu.memory_space<vmem>>, %arg3: memref<32x1xf32, #tpu.memory_space<vmem>>, %arg4: memref<16x32xf32, #tpu.memory_space<vmem>>, %arg5: memref<16x1xf32, #tpu.memory_space<vmem>>, %arg6: memref<16x1xf32, #tpu.memory_space<vmem>>, %arg7: memref<1x1xf32, #tpu.memory_space<smem>>, %arg8: memref<1x8xf32, #tpu.memory_space<vmem>>) attributes {dimension_semantics = [#tpu.dimension_semantics<parallel>], iteration_bounds = array<i64: 1>, scalar_prefetch = 0 : i64, scratch_operands = 0 : i64, tpu.core_type = #tpu.core_type<tc>, window_params = [{transform_indices = @transform_0, window_bounds = array<i64: 8, 32>}, {pipeline_mode = #tpu.pipeline_mode<synchronous>, transform_indices = @transform_1, window_bounds = array<i64: 32, 32>}, {pipeline_mode = #tpu.pipeline_mode<synchronous>, transform_indices = @transform_2, window_bounds = array<i64: 32, 1>}, {pipeline_mode = #tpu.pipeline_mode<synchronous>, transform_indices = @transform_3, window_bounds = array<i64: 16, 32>}, {pipeline_mode = #tpu.pipeline_mode<synchronous>, transform_indices = @transform_4, window_bounds = array<i64: 16, 1>}, {pipeline_mode = #tpu.pipeline_mode<synchronous>, transform_indices = @transform_5, window_bounds = array<i64: 16, 1>}, {transform_indices = @transform_6, window_bounds = array<i64: 1, 1>}, {transform_indices = @transform_7, window_bounds = array<i64: 1, 8>}]} {
    %c0 = arith.constant 0 : index
    %c0_0 = arith.constant 0 : index
    %0 = vector.load %arg1[%c0, %c0_0] : memref<8x32xf32, #tpu.memory_space<vmem>>, vector<8x32xf32>
    %c0_1 = arith.constant 0 : index
    %c0_2 = arith.constant 0 : index
    %1 = vector.load %arg2[%c0_1, %c0_2] : memref<32x32xf32, #tpu.memory_space<vmem>>, vector<32x32xf32>
    %cst = arith.constant dense<0.000000e+00> : vector<32x8xf32>
    %2 = tpu.matmul %1, %0, %cst {dimension_numbers = #tpu.dot_dimension_numbers<[1], [1], [0], [0], [0, 0, 1, 0], [], []>} : vector<32x32xf32>, vector<8x32xf32>, vector<32x8xf32> -> vector<32x8xf32>
    %c0_3 = arith.constant 0 : index
    %c0_4 = arith.constant 0 : index
    %3 = vector.load %arg3[%c0_3, %c0_4] : memref<32x1xf32, #tpu.memory_space<vmem>>, vector<32x1xf32>
    %4 = vector.broadcast %3 : vector<32x1xf32> to vector<32x8xf32>
    %5 = arith.addf %2, %4 : vector<32x8xf32>
    %6 = math.tanh %5 : vector<32x8xf32>
    %c0_5 = arith.constant 0 : index
    %c0_6 = arith.constant 0 : index
    %7 = vector.load %arg4[%c0_5, %c0_6] : memref<16x32xf32, #tpu.memory_space<vmem>>, vector<16x32xf32>
    %cst_7 = arith.constant dense<0.000000e+00> : vector<16x8xf32>
    %8 = tpu.matmul %7, %6, %cst_7 {dimension_numbers = #tpu.dot_dimension_numbers<[1], [0], [0], [1], [0, 0, 1, 1], [], []>} : vector<16x32xf32>, vector<32x8xf32>, vector<16x8xf32> -> vector<16x8xf32>
    %c0_8 = arith.constant 0 : index
    %c0_9 = arith.constant 0 : index
    %9 = vector.load %arg5[%c0_8, %c0_9] : memref<16x1xf32, #tpu.memory_space<vmem>>, vector<16x1xf32>
    %10 = vector.broadcast %9 : vector<16x1xf32> to vector<16x8xf32>
    %11 = arith.addf %8, %10 : vector<16x8xf32>
    %cst_10 = arith.constant 0.000000e+00 : f32
    %12 = vector.broadcast %cst_10 : f32 to vector<16x8xf32>
    %13 = arith.maximumf %11, %12 : vector<16x8xf32>
    %c0_11 = arith.constant 0 : index
    %c0_12 = arith.constant 0 : index
    %14 = vector.load %arg6[%c0_11, %c0_12] : memref<16x1xf32, #tpu.memory_space<vmem>>, vector<16x1xf32>
    %15 = vector.broadcast %14 : vector<16x1xf32> to vector<16x8xf32>
    %16 = arith.mulf %13, %15 : vector<16x8xf32>
    %cst_13 = arith.constant dense<0.000000e+00> : vector<8xf32>
    %17 = vector.multi_reduction <add>, %16, %cst_13 [0] : vector<16x8xf32> to vector<8xf32>
    %18 = vector.shape_cast %17 : vector<8xf32> to vector<1x8xf32>
    %c0_14 = arith.constant 0 : index
    %c0_15 = arith.constant 0 : index
    %19 = memref.load %arg7[%c0_14, %c0_15] : memref<1x1xf32, #tpu.memory_space<smem>>
    %20 = vector.broadcast %19 : f32 to vector<1x8xf32>
    %21 = arith.addf %18, %20 : vector<1x8xf32>
    %cst_16 = arith.constant 0.000000e+00 : f32
    %22 = vector.broadcast %cst_16 : f32 to vector<1x8xf32>
    %23 = arith.subf %22, %21 : vector<1x8xf32>
    %24 = math.exp %23 : vector<1x8xf32>
    %cst_17 = arith.constant 1.000000e+00 : f32
    %25 = vector.broadcast %cst_17 : f32 to vector<1x8xf32>
    %26 = arith.addf %25, %24 : vector<1x8xf32>
    %27 = tpu.reciprocal %26 : vector<1x8xf32> -> vector<1x8xf32>
    %c0_18 = arith.constant 0 : index
    %c0_19 = arith.constant 0 : index
    %28 = vector.load %arg8[%c0_18, %c0_19] : memref<1x8xf32, #tpu.memory_space<vmem>>, vector<1x8xf32>
    tpu.vector_store %arg8[%c0_18, %c0_19], %27 {strides = array<i32>} : memref<1x8xf32, #tpu.memory_space<vmem>>, vector<1x8xf32>,
    return
  }
  func.func @transform_0(%arg0: i32) -> (i32, i32) {
    %c0_i32 = arith.constant 0 : i32
    %c0_i32_0 = arith.constant 0 : i32
    return %arg0, %c0_i32 : i32, i32
  }
  func.func @transform_1(%arg0: i32) -> (i32, i32) {
    %c0_i32 = arith.constant 0 : i32
    %c0_i32_0 = arith.constant 0 : i32
    %c0_i32_1 = arith.constant 0 : i32
    return %c0_i32, %c0_i32_0 : i32, i32
  }
  func.func @transform_2(%arg0: i32) -> (i32, i32) {
    %c0_i32 = arith.constant 0 : i32
    %c0_i32_0 = arith.constant 0 : i32
    %c0_i32_1 = arith.constant 0 : i32
    return %c0_i32, %c0_i32_0 : i32, i32
  }
  func.func @transform_3(%arg0: i32) -> (i32, i32) {
    %c0_i32 = arith.constant 0 : i32
    %c0_i32_0 = arith.constant 0 : i32
    %c0_i32_1 = arith.constant 0 : i32
    return %c0_i32, %c0_i32_0 : i32, i32
  }
  func.func @transform_4(%arg0: i32) -> (i32, i32) {
    %c0_i32 = arith.constant 0 : i32
    %c0_i32_0 = arith.constant 0 : i32
    %c0_i32_1 = arith.constant 0 : i32
    return %c0_i32, %c0_i32_0 : i32, i32
  }
  func.func @transform_5(%arg0: i32) -> (i32, i32) {
    %c0_i32 = arith.constant 0 : i32
    %c0_i32_0 = arith.constant 0 : i32
    %c0_i32_1 = arith.constant 0 : i32
    return %c0_i32, %c0_i32_0 : i32, i32
  }
  func.func @transform_6(%arg0: i32) -> (i32, i32) {
    %c0_i32 = arith.constant 0 : i32
    %c0_i32_0 = arith.constant 0 : i32
    %c0_i32_1 = arith.constant 0 : i32
    return %c0_i32, %c0_i32_0 : i32, i32
  }
  func.func @transform_7(%arg0: i32) -> (i32, i32) {
    %c0_i32 = arith.constant 0 : i32
    %c0_i32_0 = arith.constant 0 : i32
    return %c0_i32, %arg0 : i32, i32
  }
}

</mosaic_0001>

<bundles_post_ra>
// kernel: tpu_custom_call.1
= control target key start
LH: loop header
LB: loop body
LE: loop exit
PB: predicated region body
PF: predicated region fallthrough
CT: control target
= control target key end

     0   :  { %vm57_vm0 = vcmask 261120   ;;  %v392_v4 = vmov 0   ;;  %s502_s0 = inlined_call_operand.vmem [shape: f32[8,32], index: 0, kind: input, shape index: {}]   ;;  %s503_s1 = inlined_call_operand.vmem [shape: f32[32,32], index: 1, kind: input, shape index: {}]   ;;  %s504_s2 = inlined_call_operand.vmem [shape: f32[32,1], index: 2, kind: input, shape index: {}]   ;;  %s505_s3 = inlined_call_operand.vmem [shape: f32[16,32], index: 3, kind: input, shape index: {}]   ;;  %s506_s4 = inlined_call_operand.vmem [shape: f32[16,1], index: 4, kind: input, shape index: {}]   ;;  %s507_s5 = inlined_call_operand.vmem [shape: f32[16,1], index: 5, kind: input, shape index: {}]   ;;  %s508_s6 = inlined_call_operand.<no memory space> [shape: f32[1,1], index: 6, kind: input, shape index: {}]   ;;  %s509_s7 = inlined_call_operand.hbm [shape: f32[1,8], index: 7, kind: output, shape index: {}]  }
   0x1   :  { %v28_v0 = vld [vmem:[%s502_s0] sm:$0xff]  ;;  %v30_v3 = vld [vmem:[%s503_s1 + $0x8] sm:$0xff]  ;;  %354 = vset.pattern.permute.xlu0 %v392_v4  ;;  %v35_v5 = vld [vmem:[%s504_s2 + $0x10] sm:$0xff]  ;;  %355 = vset.pattern.permute.xlu1 %v392_v4 }
   0x2   :  { %v29_v1 = vld [vmem:[%s503_s1] sm:$0xff]  ;;  %325 = vmatprep.subr.msk.mxu0 %vm57_vm0, %v28_v0  ;;  %v31_v6 = vld [vmem:[%s503_s1 + $0x10] sm:$0xff]  ;;  %49 = vperm.xlu1 %355, %v35_v5   ;;  %v34_v7 = vld [vmem:[%s504_s2 + $0x8] sm:$0xff] }
   0x3   :  { %327 = vmatprep.mubr.msk.f32.mxu0 %vm57_vm0, %v29_v1  ;;  %v33_v2 = vld [vmem:[%s504_s2] sm:$0xff]  ;;  %326 = vmatpush3.xpose.msk.msra.mxu0 %vm57_vm0, %v28_v0 }
   0x4   :  { %39 = vperm.xlu0 %354, %v33_v2  }
   0x5   :  { %13 = vsyncpa [#allocation4], 0  ;;  %v36_v8 = vld [vmem:[%s504_s2 + $0x18] sm:$0xff]  ;;  %v164_v10 = vld [vmem:[%s506_s4] sm:$0xff]  ;;  %vm273_vm1 = vcmask 64512   ;;  %v284_v54 = vstv %s508_s6  ;;  %s393_s27 = smov [#allocation3]  }
   0x6   :  { %328 = vmatmul.mubr.msk.f32.vlgmr.msra.gmra.mrb[0].mxu0 %vm57_vm0, %v30_v3  ;;  %v32_v9 = vld [vmem:[%s503_s1 + $0x18] sm:$0xff]  ;;  %54 = vperm.xlu1 %355, %v36_v8   ;;  %v165_v11 = vld [vmem:[%s506_s4 + $0x8] sm:$0xff]  ;;  %v259_v12 = vld [vmem:[%s507_s5] sm:$0xff]  ;;  %s299_s28 = sshll.u32 %s393_s27, 4  ;;  %vm291_vm2 = vcmask 57344   ;;  %s300_s28 = int_to_ptr.vmem [resolvable:$true] %s299_s28 }
   0x7   :  { %330 = vmatprep.mubr.msk.f32.mxu0 %vm57_vm0, %v31_v6  ;;  %v260_v13 = vld [vmem:[%s507_s5 + $0x8] sm:$0xff]  ;;  %v162_v14 = vld [vmem:[%s505_s3] sm:$0xff]  ;;  %s368_s29 = scalar_lea.vmem %s300_s28, 16  ;;  %s372_s30 = scalar_lea.vmem %s300_s28, 32 }
   0x8   :  { %44 = vperm.xlu0 %354, %v34_v7   ;;  %341 = vmatprep.mubr.msk.f32.mxu1 %vm57_vm0, %v162_v14  ;;  %v163_v33 = vld [vmem:[%s505_s3 + $0x8] sm:$0xff]  ;;  %p369_p0 = scmp.ne.s32.totalorder %s300_s28, %s368_s29  ;;  %p373_p1 = scmp.lt.s32.totalorder %s300_s28, %s300_s28 }
   0x9   :  { %p374_p2 = scmp.lt.s32.totalorder %s372_s30, %s368_s29 }
   0xa   :  { %331 = vmatmul.mubr.msk.f32.gmra.mrb[2].mxu0 %vm57_vm0, %v32_v9  ;;  %173 = vperm.xlu1 %355, %v165_v11  }
   0xb   :  { %p375_p3 = por %p374_p2, %p373_p1 }
   0xc   :  { %168 = vperm.xlu0 %354, %v164_v10  }
   0xd   :  { %p376_p4 = pnand %p375_p3, %p369_p0 }
   0xe   :  { %268 = vperm.xlu1 %355, %v260_v13  }
  0x10   :  { %263 = vperm.xlu0 %354, %v259_v12  }
  0x81   :  { %v50_v16 = vpop.permute.xlu1 %49 }
  0x83   :  { %v40_v15 = vpop.permute.xlu0 %39 }
  0x85   :  { %v55_v22 = vpop.permute.xlu1 %54 }
  0x87   :  { %v45_v17 = vpop.permute.xlu0 %44 }
  0x89   :  { %v174_v34 = vpop.permute.xlu1 %173 }
  0x8b   :  { %v169_v35 = vpop.permute.xlu0 %168 }
  0x8d   :  { %v269_v41 = vpop.permute.xlu1 %268 }
  0x8f   :  { %v264_v43 = vpop.permute.xlu0 %263 }
  0xd9   :  { %v329_v18 = vpop.f32.mrb[0].mxu0 }
  0xda   :  { %v145_v19 = vadd.f32 %v329_v18, %v45_v17  ;;  %v139_v20 = vpop.f32.mrb[1].mxu0 }
  0xdb   :  { %v140_v21 = vadd.f32 %v139_v20, %v40_v15 }
  0xdc   :  { %356 = vtanh.f32 %v145_v19 }
  0xdd   :  { %358 = vtanh.f32 %v140_v21  ;;  %v332_v23 = vpop.f32.mrb[2].mxu0 }
  0xde   :  { %v155_v24 = vadd.f32 %v332_v23, %v55_v22  ;;  %v149_v25 = vpop.f32.mrb[3].mxu0 }
  0xdf   :  { %v150_v26 = vadd.f32 %v149_v25, %v50_v16 }
  0xe0   :  { %360 = vtanh.f32 %v155_v24 }
  0xe1   :  { %362 = vtanh.f32 %v150_v26 }
  0xe6   :  { %v357_v27 = vpop.eup %356 }
  0xe7   :  { %v359_v28 = vpop.eup %358 }
  0xe8   :  { %v344_v29 = vpack.c.bf16 %v357_v27, %v359_v28 }
  0xea   :  { %v361_v30 = vpop.eup %360  ;;  %345 = vmatprep.subr.bf16.mxu1 %v344_v29 }
  0xeb   :  { %v363_v31 = vpop.eup %362  ;;  %347 = vmatpush3.bf16.msra.mxu1 %v344_v29 }
  0xec   :  { %v348_v32 = vpack.c.bf16 %v361_v30, %v363_v31 }
  0xee   :  { %349 = vmatprep.subr.bf16.mxu1 %v348_v32 }
  0xef   :  { %351 = vmatpush3.bf16.msra.mxu1 %v348_v32 }
  0xf2   :  { %342 = vmatmul.mubr.msk.f32.vlgmr.msra.gmra.mrb[0].mxu1 %vm57_vm0, %v163_v33 }
 0x1c5   :  { %v343_v36 = vpop.f32.mrb[0].mxu1 }
 0x1c6   :  { %v254_v37 = vadd.f32 %v343_v36, %v174_v34  ;;  %v248_v38 = vpop.f32.mrb[1].mxu1 }
 0x1c7   :  { %v249_v39 = vadd.f32 %v248_v38, %v169_v35 }
 0x1c8   :  { %v258_v40 = vmax.f32 %v254_v37, 0.0 }
 0x1c9   :  { %v257_v42 = vmax.f32 %v249_v39, 0.0 }
 0x1ca   :  { %v272_v44 = vmul.f32 %v269_v41, %v258_v40 }
 0x1cb   :  { %v271_v45 = vmul.f32 %v264_v43, %v257_v42 }
 0x1cc   :  { %v275_v46 = vsel %vm273_vm1, %v272_v44, 0.0 }
 0x1cd   :  { %v274_v47 = vsel %vm273_vm1, %v271_v45, 0.0 }
 0x1ce   :  { %v276_v48 = vadd.f32 %v275_v46, %v274_v47 }
 0x1d0   :  { %v277_v49 = vrot.slane %v276_v48, 4 }
 0x1d2   :  { %v278_v50 = vadd.f32 %v277_v49, %v276_v48 }
 0x1d4   :  { %v279_v51 = vrot.slane %v278_v50, 2 }
 0x1d6   :  { %v280_v52 = vadd.f32 %v279_v51, %v278_v50 }
 0x1d8   :  { %v281_v53 = vrot.slane %v280_v52, 1 }
 0x1da   :  { %v282_v55 = vadd.f32 %v281_v53, %v280_v52 }
 0x1dc   :  { %v285_v56 = vadd.f32 %v284_v54, %v282_v55 }
 0x1de   :  { %v286_v57 = vsub.f32 0.0, %v285_v56 }
 0x1e0   :  { %v287_v58 = vmul.f32 1.442695, %v286_v57 }
 0x1e2   :  { %364 = vpow2.f32 %v287_v58 }
 0x1ec   :  { %v365_v59 = vpop.eup %364 }
 0x1ed   :  { %v289_v60 = vadd.f32 1.0, %v365_v59 }
 0x1ef   :  { %366 = vrcp.f32 %v289_v60 }
 0x1f9   :  { %v367_v61 = vpop.eup %366 }
 0x1fa   :  { %292 = vst.msk [vmem:[#allocation3] sm:$0x1] %vm291_vm2, %v367_v61 }
 0x1fb   :  { %379 = shalt.err (!%p376_p4)
}
 0x1fc   :  { %s380_s0 = scalar_lea.hbm %s509_s7, 16 }
 0x1fd   :  { %p381_p5 = scmp.ne.s32.totalorder %s509_s7, %s380_s0  ;;  %p384_p6 = scmp.lt.u32.totalorder %s380_s0, %s509_s7 }
 0x1ff   :  { %p386_p7 = pnand %p384_p6, %p381_p5 }
 0x201   :  { %389 = shalt.err (!%p386_p7)
}
 0x202   :  { %302 = dma.vmem_to_hbm [thread:$0]  %s300_s28, 16, %s509_s7, [#allocation4]  }
 0x203   :  { %390 = dma.done.wait [#allocation4], 16  }
 0x204   :  { %391 = vsyncadd [#allocation4], 4294967280 }
 0x205   :  { %306 = vsyncpa [#allocation4], 1 }

</bundles_post_ra>
